<compile_context>
chip_gen: v7x
topology: tpu7x:2x2x1
jax: 0.10.0
libtpu: 0.0.40
codegen_flags: <defaults>
</compile_context>

<pallas_src>
import functools

import jax
import jax.numpy as jnp
from jax.experimental import pallas as pl
from jax.experimental.pallas import tpu as pltpu

IN_DIM = 10              # encoder in_features == decoder out_features
HID_DIM = 3              # encoder out_features == decoder in_features
GROUP = 64               # samples packed per row: 64 * 10 = 640 = 5 * 128 lanes
PACK_IN = GROUP * IN_DIM     # 640 lanes  (input / output packed width)
PACK_HID = GROUP * HID_DIM   # 192 lanes  (hidden packed width)
DEFAULT_TB = 32768       # samples per block (512 rows x 640 lanes = 1.25 MiB)
MAX_TB = 65536           # cap: double-buffered in+out stays well under 16 MiB


def autoencoder_kernel(x_ref, enc_ref, dec_ref, o_ref, *, compute_dtype):
    # Packed params (DMA'd once, constant block index, VMEM-resident):
    #   enc_ref = [kron(I_64, W1^T) | tile(b1, 64)] -> (641, 192)
    #   dec_ref = [kron(I_64, W2^T) | tile(b2, 64)] -> (193, 640)
    w1 = enc_ref[:PACK_IN, :].astype(compute_dtype)     # (640, 192) block-diagonal
    b1 = enc_ref[PACK_IN:, :]                           # (1, 192) f32
    w2 = dec_ref[:PACK_HID, :].astype(compute_dtype)    # (192, 640) block-diagonal
    b2 = dec_ref[PACK_HID:, :]                          # (1, 640) f32

    x = x_ref[...]                                      # (tbr, 640) lane-dense block
    # Encoder: relu(x @ W1^T + b1) applied per 64-sample group via the
    # block-diagonal expanded weight; f32 accumulation on the MXU.
    z = jnp.dot(x.astype(compute_dtype), w1, preferred_element_type=jnp.float32) + b1
    z = jnp.maximum(z, 0.0)
    # Decoder: z @ W2^T + b2.
    y = jnp.dot(z.astype(compute_dtype), w2, preferred_element_type=jnp.float32) + b2
    o_ref[...] = y.astype(o_ref.dtype)                  # lane-dense (tbr, 640) store


def prepare_params(w_enc, b_enc, w_dec, b_dec):
    """Pack PyTorch-convention params ((out, in) weights, (out,) biases) ONCE into
    two slabs holding the block-diagonal expanded weights + tiled biases:
        enc_p = [kron(I_64, W1^T) | tile(b1, 64)] -> (641, 192)
        dec_p = [kron(I_64, W2^T) | tile(b2, 64)] -> (193, 640)
    """
    eye = jnp.eye(GROUP, dtype=jnp.float32)
    w1_big = jnp.kron(eye, w_enc.T.astype(jnp.float32))            # (640, 192)
    w2_big = jnp.kron(eye, w_dec.T.astype(jnp.float32))            # (192, 640)
    b1_big = jnp.tile(b_enc.astype(jnp.float32), GROUP)[None, :]   # (1, 192)
    b2_big = jnp.tile(b_dec.astype(jnp.float32), GROUP)[None, :]   # (1, 640)
    enc_p = jnp.concatenate([w1_big, b1_big], axis=0)              # (641, 192)
    dec_p = jnp.concatenate([w2_big, b2_big], axis=0)              # (193, 640)
    return enc_p, dec_p


def _choose_row_tile(num_rows, target_rows):
    """Pick the block row count (multiple of 8, or == num_rows) targeting
    `target_rows` packed rows per block, with a best-effort EVEN tile count >= 2
    so v7x's two TensorCores stay balanced (no-op on single-TC v5e/v6e)."""
    target_rows = max(8, (target_rows // 8) * 8)
    ntiles = pl.cdiv(num_rows, target_rows)
    if ntiles == 1:
        if num_rows < 16:            # too little work to split across cores
            return num_rows
        ntiles = 2
    elif ntiles % 2:
        ntiles += 1                  # even tile count for 2 TensorCores
    tbr = ((pl.cdiv(num_rows, ntiles) + 7) // 8) * 8
    return min(tbr, num_rows)


@functools.partial(jax.jit, static_argnames=("tb", "compute_dtype"))
def autoencoder_forward(x, enc_p, dec_p, *, tb=DEFAULT_TB, compute_dtype=jnp.bfloat16):
    """x: (B, IN_DIM) float32. enc_p/dec_p from prepare_params. Returns (B, IN_DIM)."""
    B = x.shape[0]
    x = x.astype(jnp.float32)

    # Pad only up to a multiple of GROUP=64 (not of the tile); skipped entirely
    # when B is already a multiple of 64.
    Bp = pl.cdiv(B, GROUP) * GROUP
    if Bp != B:
        x = jnp.pad(x, ((0, Bp - B), (0, 0)))

    # Free row-major reshape (bitcast, not a transpose/copy): batch packed so the
    # last dim is 640 = 5*128 -> lane-dense DMA and unmasked vst stores.
    R = Bp // GROUP
    xg = x.reshape(R, PACK_IN)

    tbr = _choose_row_tile(R, min(max(tb, GROUP), MAX_TB) // GROUP)
    grid = (pl.cdiv(R, tbr),)

    yg = pl.pallas_call(
        functools.partial(autoencoder_kernel, compute_dtype=compute_dtype),
        out_shape=jax.ShapeDtypeStruct((R, PACK_IN), jnp.float32),
        grid=grid,
        in_specs=[
            # Batch tile, auto double-buffered over the grid (1.25 MiB at defaults).
            pl.BlockSpec((tbr, PACK_IN), lambda i: (i, 0)),
            # Packed params: constant block index -> DMA'd once, VMEM-resident.
            pl.BlockSpec(enc_p.shape, lambda i: (0, 0)),
            pl.BlockSpec(dec_p.shape, lambda i: (0, 0)),
        ],
        out_specs=pl.BlockSpec((tbr, PACK_IN), lambda i: (i, 0)),
        compiler_params=pltpu.CompilerParams(
            # Batch tiles are independent -> megacore / dual-TC sharding on v7x.
            dimension_semantics=("parallel",),
        ),
    )(xg, enc_p, dec_p)

    y = yg.reshape(Bp, IN_DIM)            # free reshape back to (Bp, 10)
    return y[:B] if Bp != B else y


if __name__ == "__main__":
    key = jax.random.PRNGKey(0)
    k_x, k_x2, k_w1, k_b1, k_w2, k_b2 = jax.random.split(key, 6)

    # Deterministic init mimicking torch.nn.Linear default U[-1/sqrt(fan_in), +].
    bound_e = 1.0 / jnp.sqrt(jnp.float32(IN_DIM))
    bound_d = 1.0 / jnp.sqrt(jnp.float32(HID_DIM))
    w_enc = jax.random.uniform(k_w1, (HID_DIM, IN_DIM), jnp.float32, -bound_e, bound_e)
    b_enc = jax.random.uniform(k_b1, (HID_DIM,), jnp.float32, -bound_e, bound_e)
    w_dec = jax.random.uniform(k_w2, (IN_DIM, HID_DIM), jnp.float32, -bound_d, bound_d)
    b_dec = jax.random.uniform(k_b2, (IN_DIM,), jnp.float32, -bound_d, bound_d)

    enc_p, dec_p = prepare_params(w_enc, b_enc, w_dec, b_dec)

    def reference(xs):
        z = jnp.maximum(xs @ w_enc.T + b_enc, 0.0)
        return z @ w_dec.T + b_dec

    # 1) Default perf config (bf16 MXU inputs, f32 accumulate), B not a multiple
    #    of 64 -> exercises the small pad + single-tile path.
    BATCH = 200
    x = jax.random.normal(k_x, (BATCH, IN_DIM), jnp.float32)
    out = jax.block_until_ready(autoencoder_forward(x, enc_p, dec_p))
    assert out.shape == (BATCH, IN_DIM)
    assert jnp.allclose(out, reference(x), atol=3e-2, rtol=3e-2)

    # 2) Exact f32 compute path — bit-level semantics of the torch forward.
    out32 = jax.block_until_ready(
        autoencoder_forward(x, enc_p, dec_p, compute_dtype=jnp.float32))
    assert jnp.allclose(out32, reference(x), atol=1e-5, rtol=1e-5)

    # 3) Multi-tile grid with a ragged last block (R=25 rows, 16-row blocks -> 2
    #    tiles, last one partial) — exercises the pipelined grid + block clipping.
    B2 = 1600
    x2 = jax.random.normal(k_x2, (B2, IN_DIM), jnp.float32)
    out2 = jax.block_until_ready(
        autoencoder_forward(x2, enc_p, dec_p, tb=1024, compute_dtype=jnp.float32))
    assert out2.shape == (B2, IN_DIM)
    assert jnp.allclose(out2, reference(x2), atol=1e-5, rtol=1e-5)

    print("KERNEL_OK")
</pallas_src>

<mosaic_0001>
module attributes {stable_mosaic.version = 11 : i64} {
  func.func @autoencoder_kernel(%arg0: i32, %arg1: memref<4x640xf32, #tpu.memory_space<vmem>>, %arg2: memref<641x192xf32, #tpu.memory_space<vmem>>, %arg3: memref<193x640xf32, #tpu.memory_space<vmem>>, %arg4: memref<4x640xf32, #tpu.memory_space<vmem>>) attributes {dimension_semantics = [#tpu.dimension_semantics<parallel>], iteration_bounds = array<i64: 1>, scalar_prefetch = 0 : i64, scratch_operands = 0 : i64, tpu.core_type = #tpu.core_type<tc>, window_params = [{transform_indices = @transform_0, window_bounds = array<i64: 4, 640>}, {pipeline_mode = #tpu.pipeline_mode<synchronous>, transform_indices = @transform_1, window_bounds = array<i64: 641, 192>}, {pipeline_mode = #tpu.pipeline_mode<synchronous>, transform_indices = @transform_2, window_bounds = array<i64: 193, 640>}, {transform_indices = @transform_3, window_bounds = array<i64: 4, 640>}]} {
    %c0 = arith.constant 0 : index
    %c0_0 = arith.constant 0 : index
    %0 = vector.load %arg2[%c0, %c0_0] : memref<641x192xf32, #tpu.memory_space<vmem>>, vector<640x192xf32>
    %1 = arith.truncf %0 : vector<640x192xf32> to vector<640x192xbf16>
    %c640 = arith.constant 640 : index
    %c0_1 = arith.constant 0 : index
    %2 = vector.load %arg2[%c640, %c0_1] : memref<641x192xf32, #tpu.memory_space<vmem>>, vector<1x192xf32>
    %c0_2 = arith.constant 0 : index
    %c0_3 = arith.constant 0 : index
    %3 = vector.load %arg3[%c0_2, %c0_3] : memref<193x640xf32, #tpu.memory_space<vmem>>, vector<192x640xf32>
    %4 = arith.truncf %3 : vector<192x640xf32> to vector<192x640xbf16>
    %c192 = arith.constant 192 : index
    %c0_4 = arith.constant 0 : index
    %5 = vector.load %arg3[%c192, %c0_4] : memref<193x640xf32, #tpu.memory_space<vmem>>, vector<1x640xf32>
    %c0_5 = arith.constant 0 : index
    %c0_6 = arith.constant 0 : index
    %6 = vector.load %arg1[%c0_5, %c0_6] : memref<4x640xf32, #tpu.memory_space<vmem>>, vector<4x640xf32>
    %7 = arith.truncf %6 : vector<4x640xf32> to vector<4x640xbf16>
    %cst = arith.constant dense<0.000000e+00> : vector<4x192xf32>
    %8 = tpu.matmul %7, %1, %cst {dimension_numbers = #tpu.dot_dimension_numbers<[1], [0], [0], [1], [0, 0, 1, 1], [], []>} : vector<4x640xbf16>, vector<640x192xbf16>, vector<4x192xf32> -> vector<4x192xf32>
    %9 = vector.broadcast %2 : vector<1x192xf32> to vector<4x192xf32>
    %10 = arith.addf %8, %9 : vector<4x192xf32>
    %cst_7 = arith.constant 0.000000e+00 : f32
    %11 = vector.broadcast %cst_7 : f32 to vector<4x192xf32>
    %12 = arith.maximumf %10, %11 : vector<4x192xf32>
    %13 = arith.truncf %12 : vector<4x192xf32> to vector<4x192xbf16>
    %cst_8 = arith.constant dense<0.000000e+00> : vector<4x640xf32>
    %14 = tpu.matmul %13, %4, %cst_8 {dimension_numbers = #tpu.dot_dimension_numbers<[1], [0], [0], [1], [0, 0, 1, 1], [], []>} : vector<4x192xbf16>, vector<192x640xbf16>, vector<4x640xf32> -> vector<4x640xf32>
    %15 = vector.broadcast %5 : vector<1x640xf32> to vector<4x640xf32>
    %16 = arith.addf %14, %15 : vector<4x640xf32>
    %c0_9 = arith.constant 0 : index
    %c0_10 = arith.constant 0 : index
    %17 = vector.load %arg4[%c0_9, %c0_10] : memref<4x640xf32, #tpu.memory_space<vmem>>, vector<4x640xf32>
    tpu.vector_store %arg4[%c0_9, %c0_10], %16 {strides = array<i32>} : memref<4x640xf32, #tpu.memory_space<vmem>>, vector<4x640xf32>,
    return
  }
  func.func @transform_0(%arg0: i32) -> (i32, i32) {
    %c0_i32 = arith.constant 0 : i32
    %c0_i32_0 = arith.constant 0 : i32
    return %arg0, %c0_i32 : i32, i32
  }
  func.func @transform_1(%arg0: i32) -> (i32, i32) {
    %c0_i32 = arith.constant 0 : i32
    %c0_i32_0 = arith.constant 0 : i32
    %c0_i32_1 = arith.constant 0 : i32
    return %c0_i32, %c0_i32_0 : i32, i32
  }
  func.func @transform_2(%arg0: i32) -> (i32, i32) {
    %c0_i32 = arith.constant 0 : i32
    %c0_i32_0 = arith.constant 0 : i32
    %c0_i32_1 = arith.constant 0 : i32
    return %c0_i32, %c0_i32_0 : i32, i32
  }
  func.func @transform_3(%arg0: i32) -> (i32, i32) {
    %c0_i32 = arith.constant 0 : i32
    %c0_i32_0 = arith.constant 0 : i32
    return %arg0, %c0_i32 : i32, i32
  }
}

</mosaic_0001>

<bundles_post_ra>
// kernel: autoencoder_forward.1
= control target key start
LH: loop header
LB: loop body
LE: loop exit
PB: predicated region body
PF: predicated region fallthrough
CT: control target
= control target key end

     0   :  { %vm619_vm0 = vcmask 523264   ;;  %s1720_s1 = inlined_call_operand.vmem [shape: f32[641,192], index: 1, kind: input, shape index: {}]   ;;  %s1721_s0 = inlined_call_operand.vmem [shape: f32[4,640], index: 0, kind: input, shape index: {}]   ;;  %s1722_s2 = inlined_call_operand.vmem [shape: f32[193,640], index: 2, kind: input, shape index: {}]   ;;  %s1723_s3 = inlined_call_operand.vmem [shape: f32[4,640], index: 3, kind: output, shape index: {}]  }
   0x1   :  { %v16_v0 = vld [vmem:[%s1720_s1 + $0x8] sm:$0xff]  ;;  %v18_v1 = vld [vmem:[%s1720_s1 + $0x18] sm:$0xff]  ;;  %v15_v2 = vld [vmem:[%s1720_s1] sm:$0xff] }
   0x2   :  { %v176_v3 = vpack.c.bf16 %v18_v1, %v16_v0  ;;  %v17_v4 = vld [vmem:[%s1720_s1 + $0x10] sm:$0xff]  ;;  %v20_v5 = vld [vmem:[%s1720_s1 + $0x28] sm:$0xff]  ;;  %v22_v6 = vld [vmem:[%s1720_s1 + $0x38] sm:$0xff] }
   0x3   :  { %v175_v7 = vpack.c.bf16 %v17_v4, %v15_v2  ;;  %v178_v8 = vpack.c.bf16 %v22_v6, %v20_v5  ;;  %v19_v9 = vld [vmem:[%s1720_s1 + $0x20] sm:$0xff]  ;;  %v21_v10 = vld [vmem:[%s1720_s1 + $0x30] sm:$0xff]  ;;  %v24_v11 = vld [vmem:[%s1720_s1 + $0x48] sm:$0xff] }
   0x4   :  { %466 = vmatprep.subr.bf16.mxu0 %v176_v3  ;;  %v26_v12 = vld [vmem:[%s1720_s1 + $0x58] sm:$0xff]  ;;  %v177_v13 = vpack.c.bf16 %v21_v10, %v19_v9  ;;  %v23_v15 = vld [vmem:[%s1720_s1 + $0x40] sm:$0xff]  ;;  %v25_v16 = vld [vmem:[%s1720_s1 + $0x50] sm:$0xff] }
   0x5   :  { %467 = vmatpush1.bf16.msra.mxu0 %v175_v7  ;;  %v180_v14 = vpack.c.bf16 %v26_v12, %v24_v11  ;;  %v28_v17 = vld [vmem:[%s1720_s1 + $0x68] sm:$0xff]  ;;  %v30_v18 = vld [vmem:[%s1720_s1 + $0x78] sm:$0xff]  ;;  %v179_v19 = vpack.c.bf16 %v25_v16, %v23_v15  ;;  %v27_v21 = vld [vmem:[%s1720_s1 + $0x60] sm:$0xff] }
   0x6   :  { %468 = vmatprep.subr.bf16.mxu0 %v178_v8  ;;  %v182_v20 = vpack.c.bf16 %v30_v18, %v28_v17  ;;  %v29_v22 = vld [vmem:[%s1720_s1 + $0x70] sm:$0xff]  ;;  %v32_v23 = vld [vmem:[%s1720_s1 + $0x88] sm:$0xff]  ;;  %v34_v24 = vld [vmem:[%s1720_s1 + $0x98] sm:$0xff] }
   0x7   :  { %v181_v25 = vpack.c.bf16 %v29_v22, %v27_v21  ;;  %v184_v26 = vpack.c.bf16 %v34_v24, %v32_v23  ;;  %v31_v27 = vld [vmem:[%s1720_s1 + $0x80] sm:$0xff]  ;;  %v33_v28 = vld [vmem:[%s1720_s1 + $0x90] sm:$0xff]  ;;  %v36_v29 = vld [vmem:[%s1720_s1 + $0xa8] sm:$0xff] }
   0x8   :  { %v38_v30 = vld [vmem:[%s1720_s1 + $0xb8] sm:$0xff]  ;;  %v183_v31 = vpack.c.bf16 %v33_v28, %v31_v27  ;;  %v35_v33 = vld [vmem:[%s1720_s1 + $0xa0] sm:$0xff]  ;;  %v37_v34 = vld [vmem:[%s1720_s1 + $0xb0] sm:$0xff] }
   0x9   :  { %469 = vmatpush1.bf16.msra.mxu0 %v177_v13  ;;  %v186_v32 = vpack.c.bf16 %v38_v30, %v36_v29  ;;  %v40_v35 = vld [vmem:[%s1720_s1 + $0xc8] sm:$0xff]  ;;  %v42_v36 = vld [vmem:[%s1720_s1 + $0xd8] sm:$0xff]  ;;  %v185_v37 = vpack.c.bf16 %v37_v34, %v35_v33  ;;  %v39_v39 = vld [vmem:[%s1720_s1 + $0xc0] sm:$0xff] }
   0xa   :  { %470 = vmatprep.subr.bf16.mxu0 %v180_v14  ;;  %v188_v38 = vpack.c.bf16 %v42_v36, %v40_v35  ;;  %v41_v40 = vld [vmem:[%s1720_s1 + $0xd0] sm:$0xff]  ;;  %v887_v41 = vld [vmem:[%s1721_s0] sm:$0xff]  ;;  %v44_v42 = vld [vmem:[%s1720_s1 + $0xe8] sm:$0xff] }
   0xb   :  { %v46_v43 = vld [vmem:[%s1720_s1 + $0xf8] sm:$0xff]  ;;  %v446_v44 = vcombine.high %v887_v41, %v887_v41  ;;  %v187_v45 = vpack.c.bf16 %v41_v40, %v39_v39  ;;  %v43_v48 = vld [vmem:[%s1720_s1 + $0xe0] sm:$0xff]  ;;  %v45_v49 = vld [vmem:[%s1720_s1 + $0xf0] sm:$0xff] }
   0xc   :  { %v190_v47 = vpack.c.bf16 %v46_v43, %v44_v42  ;;  %v48_v50 = vld [vmem:[%s1720_s1 + $0x108] sm:$0xff]  ;;  %v50_v51 = vld [vmem:[%s1720_s1 + $0x118] sm:$0xff]  ;;  %v189_v52 = vpack.c.bf16 %v45_v49, %v43_v48  ;;  %v47_v54 = vld [vmem:[%s1720_s1 + $0x100] sm:$0xff] }
   0xd   :  { %471 = vmatpush1.bf16.msra.mxu0 %v179_v19  ;;  %v451_v46 = vpack.c.bf16 %v446_v44, %v446_v44  ;;  %v192_v53 = vpack.c.bf16 %v50_v51, %v48_v50  ;;  %v49_v55 = vld [vmem:[%s1720_s1 + $0x110] sm:$0xff]  ;;  %v52_v56 = vld [vmem:[%s1720_s1 + $0x128] sm:$0xff]  ;;  %v54_v57 = vld [vmem:[%s1720_s1 + $0x138] sm:$0xff] }
   0xe   :  { %472 = vmatprep.subr.bf16.mxu0 %v182_v20  ;;  %v191_v58 = vpack.c.bf16 %v49_v55, %v47_v54  ;;  %v194_v59 = vpack.c.bf16 %v54_v57, %v52_v56  ;;  %v51_v60 = vld [vmem:[%s1720_s1 + $0x120] sm:$0xff]  ;;  %v53_v61 = vld [vmem:[%s1720_s1 + $0x130] sm:$0xff]  ;;  %v56_v62 = vld [vmem:[%s1720_s1 + $0x148] sm:$0xff] }
   0xf   :  { %498 = vmatprep.mubr.bf16.mxu0 %v451_v46  ;;  %v58_v63 = vld [vmem:[%s1720_s1 + $0x158] sm:$0xff]  ;;  %v193_v0 = vpack.c.bf16 %v53_v61, %v51_v60  ;;  %v55_v2 = vld [vmem:[%s1720_s1 + $0x140] sm:$0xff]  ;;  %v57_v3 = vld [vmem:[%s1720_s1 + $0x150] sm:$0xff] }
  0x10   :  { %v196_v1 = vpack.c.bf16 %v58_v63, %v56_v62  ;;  %v60_v4 = vld [vmem:[%s1720_s1 + $0x168] sm:$0xff]  ;;  %v62_v5 = vld [vmem:[%s1720_s1 + $0x178] sm:$0xff]  ;;  %v195_v6 = vpack.c.bf16 %v57_v3, %v55_v2  ;;  %v59_v8 = vld [vmem:[%s1720_s1 + $0x160] sm:$0xff] }
  0x11   :  { %473 = vmatpush1.bf16.msra.mxu0 %v181_v25  ;;  %v198_v7 = vpack.c.bf16 %v62_v5, %v60_v4  ;;  %v61_v9 = vld [vmem:[%s1720_s1 + $0x170] sm:$0xff]  ;;  %v64_v10 = vld [vmem:[%s1720_s1 + $0x188] sm:$0xff]  ;;  %v66_v11 = vld [vmem:[%s1720_s1 + $0x198] sm:$0xff] }
  0x12   :  { %474 = vmatprep.subr.bf16.mxu0 %v184_v26  ;;  %v197_v12 = vpack.c.bf16 %v61_v9, %v59_v8  ;;  %v200_v13 = vpack.c.bf16 %v66_v11, %v64_v10  ;;  %v63_v14 = vld [vmem:[%s1720_s1 + $0x180] sm:$0xff]  ;;  %v65_v15 = vld [vmem:[%s1720_s1 + $0x190] sm:$0xff]  ;;  %v68_v16 = vld [vmem:[%s1720_s1 + $0x1a8] sm:$0xff] }
  0x13   :  { %v70_v17 = vld [vmem:[%s1720_s1 + $0x1b8] sm:$0xff]  ;;  %v199_v18 = vpack.c.bf16 %v65_v15, %v63_v14  ;;  %v67_v20 = vld [vmem:[%s1720_s1 + $0x1a0] sm:$0xff]  ;;  %v69_v21 = vld [vmem:[%s1720_s1 + $0x1b0] sm:$0xff] }
  0x14   :  { %v202_v19 = vpack.c.bf16 %v70_v17, %v68_v16  ;;  %v72_v22 = vld [vmem:[%s1720_s1 + $0x1c8] sm:$0xff]  ;;  %v74_v23 = vld [vmem:[%s1720_s1 + $0x1d8] sm:$0xff]  ;;  %v201_v24 = vpack.c.bf16 %v69_v21, %v67_v20  ;;  %v71_v26 = vld [vmem:[%s1720_s1 + $0x1c0] sm:$0xff] }
  0x15   :  { %475 = vmatpush1.bf16.msra.mxu0 %v183_v31  ;;  %v204_v25 = vpack.c.bf16 %v74_v23, %v72_v22  ;;  %v73_v27 = vld [vmem:[%s1720_s1 + $0x1d0] sm:$0xff]  ;;  %v76_v28 = vld [vmem:[%s1720_s1 + $0x1e8] sm:$0xff]  ;;  %v78_v29 = vld [vmem:[%s1720_s1 + $0x1f8] sm:$0xff] }
  0x16   :  { %476 = vmatprep.subr.bf16.mxu0 %v186_v32  ;;  %v258_v30 = vld [vmem:[%s1722_s2 + $0x8] sm:$0xff]  ;;  %v263_v31 = vld [vmem:[%s1722_s2 + $0x30] sm:$0xff]  ;;  %v75_v32 = vld [vmem:[%s1720_s1 + $0x1e0] sm:$0xff]  ;;  %v206_v44 = vpack.c.bf16 %v78_v29, %v76_v28 }
  0x17   :  { %v77_v33 = vld [vmem:[%s1720_s1 + $0x1f0] sm:$0xff]  ;;  %v378_v34 = vpack.c.bf16 %v263_v31, %v258_v30  ;;  %v257_v35 = vld [vmem:[%s1722_s2] sm:$0xff]  ;;  %v262_v36 = vld [vmem:[%s1722_s2 + $0x28] sm:$0xff] }
  0x18   :  { %v377_v39 = vpack.c.bf16 %v262_v36, %v257_v35  ;;  %v273_v40 = vld [vmem:[%s1722_s2 + $0x80] sm:$0xff]  ;;  %v267_v42 = vld [vmem:[%s1722_s2 + $0x50] sm:$0xff]  ;;  %v272_v43 = vld [vmem:[%s1722_s2 + $0x78] sm:$0xff]  ;;  %v205_v55 = vpack.c.bf16 %v77_v33, %v75_v32 }
  0x19   :  { %477 = vmatpush1.bf16.msra.mxu0 %v185_v37  ;;  %v268_v37 = vld [vmem:[%s1722_s2 + $0x58] sm:$0xff]  ;;  %623 = vmatprep.subr.bf16.mxu1 %v378_v34  ;;  %v283_v48 = vld [vmem:[%s1722_s2 + $0xd0] sm:$0xff]  ;;  %v80_v49 = vld [vmem:[%s1720_s1 + $0x208] sm:$0xff]  ;;  %v382_v51 = vpack.c.bf16 %v272_v43, %v267_v42 }
  0x1a   :  { %478 = vmatprep.subr.bf16.mxu0 %v188_v38  ;;  %v203_v38 = vpack.c.bf16 %v73_v27, %v71_v26  ;;  %v383_v46 = vpack.c.bf16 %v273_v40, %v268_v37  ;;  %v82_v50 = vld [vmem:[%s1720_s1 + $0x218] sm:$0xff]  ;;  %624 = vmatpush1.bf16.msra.mxu1 %v377_v39  ;;  %v282_v54 = vld [vmem:[%s1722_s2 + $0xc8] sm:$0xff]  ;;  %v79_v60 = vld [vmem:[%s1720_s1 + $0x200] sm:$0xff] }
  0x1b   :  { %v288_v57 = vld [vmem:[%s1722_s2 + $0xf8] sm:$0xff]  ;;  %v81_v61 = vld [vmem:[%s1720_s1 + $0x210] sm:$0xff]  ;;  %v84_v62 = vld [vmem:[%s1720_s1 + $0x228] sm:$0xff] }
  0x1c   :  { %625 = vmatprep.subr.bf16.mxu1 %v383_v46  ;;  %v86_v63 = vld [vmem:[%s1720_s1 + $0x238] sm:$0xff]  ;;  %v287_v3 = vld [vmem:[%s1722_s2 + $0xf0] sm:$0xff]  ;;  %v207_v5 = vpack.c.bf16 %v81_v61, %v79_v60  ;;  %v83_v9 = vld [vmem:[%s1720_s1 + $0x220] sm:$0xff] }
  0x1d   :  { %479 = vmatpush1.bf16.msra.mxu0 %v187_v45  ;;  %v1026_v45 = vld [vmem:[%s1721_s0 + $0x8] sm:$0xff]  ;;  %v292_v4 = vld [vmem:[%s1722_s2 + $0x118] sm:$0xff]  ;;  %v210_v8 = vpack.c.bf16 %v86_v63, %v84_v62  ;;  %v85_v10 = vld [vmem:[%s1720_s1 + $0x230] sm:$0xff] }
  0x1e   :  { %480 = vmatprep.subr.bf16.mxu0 %v190_v47  ;;  %v278_v47 = vld [vmem:[%s1722_s2 + $0xa8] sm:$0xff]  ;;  %v447_v56 = vcombine.high %v1026_v45, %v1026_v45  ;;  %626 = vmatpush1.bf16.msra.mxu1 %v382_v51  ;;  %v297_v15 = vld [vmem:[%s1722_s2 + $0x140] sm:$0xff]  ;;  %v209_v17 = vpack.c.bf16 %v85_v10, %v83_v9  ;;  %v89_v22 = vld [vmem:[%s1720_s1 + $0x250] sm:$0xff] }
  0x1f   :  { %v88_v11 = vld [vmem:[%s1720_s1 + $0x248] sm:$0xff]  ;;  %v87_v21 = vld [vmem:[%s1720_s1 + $0x240] sm:$0xff]  ;;  %v307_v27 = vld [vmem:[%s1722_s2 + $0x190] sm:$0xff] }
  0x20   :  { %v302_v16 = vld [vmem:[%s1722_s2 + $0x168] sm:$0xff]  ;;  %v312_v28 = vld [vmem:[%s1722_s2 + $0x1b8] sm:$0xff]  ;;  %v211_v29 = vpack.c.bf16 %v89_v22, %v87_v21  ;;  %v323_v31 = vld [vmem:[%s1722_s2 + $0x210] sm:$0xff] }
  0x21   :  { %481 = vmatpush1.bf16.msra.mxu0 %v189_v52  ;;  %v388_v52 = vpack.c.bf16 %v283_v48, %v278_v47  ;;  %v92_v23 = vld [vmem:[%s1720_s1 + $0x268] sm:$0xff]  ;;  %v91_v33 = vld [vmem:[%s1720_s1 + $0x260] sm:$0xff]  ;;  %v93_v34 = vld [vmem:[%s1720_s1 + $0x270] sm:$0xff]  ;;  %v402_v37 = vpack.c.bf16 %v312_v28, %v307_v27 }
  0x22   :  { %482 = vmatprep.subr.bf16.mxu0 %v192_v53  ;;  %v277_v53 = vld [vmem:[%s1722_s2 + $0xa0] sm:$0xff]  ;;  %v318_v30 = vld [vmem:[%s1722_s2 + $0x1e8] sm:$0xff]  ;;  %v98_v36 = vld [vmem:[%s1720_s1 + $0x298] sm:$0xff]  ;;  %v213_v42 = vpack.c.bf16 %v93_v34, %v91_v33 }
  0x23   :  { %627 = vmatprep.subr.bf16.mxu1 %v388_v52  ;;  %v96_v35 = vld [vmem:[%s1720_s1 + $0x288] sm:$0xff]  ;;  %v317_v39 = vld [vmem:[%s1722_s2 + $0x1e0] sm:$0xff]  ;;  %v328_v43 = vld [vmem:[%s1722_s2 + $0x238] sm:$0xff] }
  0x24   :  { %v322_v40 = vld [vmem:[%s1722_s2 + $0x208] sm:$0xff]  ;;  %v216_v46 = vpack.c.bf16 %v98_v36, %v96_v35  ;;  %v95_v47 = vld [vmem:[%s1720_s1 + $0x280] sm:$0xff]  ;;  %v97_v48 = vld [vmem:[%s1720_s1 + $0x290] sm:$0xff] }
  0x25   :  { %483 = vmatpush1.bf16.msra.mxu0 %v191_v58  ;;  %v293_v58 = vld [vmem:[%s1722_s2 + $0x120] sm:$0xff]  ;;  %v407_v51 = vpack.c.bf16 %v322_v40, %v317_v39  ;;  %v101_v60 = vld [vmem:[%s1720_s1 + $0x2b0] sm:$0xff]  ;;  %v104_v61 = vld [vmem:[%s1720_s1 + $0x2c8] sm:$0xff] }
  0x26   :  { %484 = vmatprep.subr.bf16.mxu0 %v194_v59  ;;  %v208_v59 = vpack.c.bf16 %v82_v50, %v80_v49  ;;  %v393_v2 = vpack.c.bf16 %v293_v58, %v288_v57  ;;  %v100_v49 = vld [vmem:[%s1720_s1 + $0x2a8] sm:$0xff]  ;;  %v102_v50 = vld [vmem:[%s1720_s1 + $0x2b8] sm:$0xff]  ;;  %v343_v57 = vld [vmem:[%s1722_s2 + $0x2b0] sm:$0xff] }
  0x27   :  { %v218_v58 = vpack.c.bf16 %v102_v50, %v100_v49  ;;  %v106_v62 = vld [vmem:[%s1720_s1 + $0x2d8] sm:$0xff]  ;;  %v119_v35 = vld [vmem:[%s1720_s1 + $0x340] sm:$0xff]  ;;  %v121_v36 = vld [vmem:[%s1720_s1 + $0x350] sm:$0xff] }
  0x28   :  { %v110_v9 = vld [vmem:[%s1720_s1 + $0x2f8] sm:$0xff]  ;;  %v227_v39 = vpack.c.bf16 %v121_v36, %v119_v35  ;;  %v127_v49 = vld [vmem:[%s1720_s1 + $0x380] sm:$0xff]  ;;  %v129_v50 = vld [vmem:[%s1720_s1 + $0x390] sm:$0xff] }
  0x29   :  { %485 = vmatpush1.bf16.msra.mxu0 %v193_v0  ;;  %v387_v0 = vpack.c.bf16 %v282_v54, %v277_v53  ;;  %v327_v53 = vld [vmem:[%s1722_s2 + $0x230] sm:$0xff]  ;;  %v332_v54 = vld [vmem:[%s1722_s2 + $0x258] sm:$0xff]  ;;  %v164_v35 = vld [vmem:[%s1720_s1 + $0x4a8] sm:$0xff] }
  0x2a   :  { %486 = vmatprep.subr.bf16.mxu0 %v196_v1  ;;  %v450_v1 = vpack.c.bf16 %v887_v41, %v887_v41  ;;  %v303_v41 = vld [vmem:[%s1722_s2 + $0x170] sm:$0xff]  ;;  %v412_v63 = vpack.c.bf16 %v332_v54, %v327_v53  ;;  %v231_v53 = vpack.c.bf16 %v129_v50, %v127_v49  ;;  %v166_v36 = vld [vmem:[%s1720_s1 + $0x4b8] sm:$0xff]  ;;  %v172_v49 = vld [vmem:[%s1720_s1 + $0x4e8] sm:$0xff] }
  0x2b   :  { %628 = vmatpush1.bf16.msra.mxu1 %v387_v0  ;;  %v174_v50 = vld [vmem:[%s1720_s1 + $0x4f8] sm:$0xff] }
  0x2c   :  { %629 = vmatprep.subr.bf16.mxu1 %v393_v2  ;;  %v342_v2 = vld [vmem:[%s1722_s2 + $0x2a8] sm:$0xff] }
  0x2d   :  { %487 = vmatpush1.bf16.msra.mxu0 %v195_v6  ;;  %v453_v6 = vpack.c.bf16 %v447_v56, %v447_v56  ;;  %v338_v56 = vld [vmem:[%s1722_s2 + $0x288] sm:$0xff] }
  0x2e   :  { %488 = vmatprep.subr.bf16.mxu0 %v198_v7  ;;  %v298_v7 = vld [vmem:[%s1722_s2 + $0x148] sm:$0xff]  ;;  %v418_v0 = vpack.c.bf16 %v343_v57, %v338_v56  ;;  %v133_v56 = vld [vmem:[%s1720_s1 + $0x3b0] sm:$0xff] }
  0x2f   :  { %v398_v14 = vpack.c.bf16 %v303_v41, %v298_v7  ;;  %v103_v7 = vld [vmem:[%s1720_s1 + $0x2c0] sm:$0xff]  ;;  %v105_v41 = vld [vmem:[%s1720_s1 + $0x2d0] sm:$0xff]  ;;  %v136_v57 = vld [vmem:[%s1720_s1 + $0x3c8] sm:$0xff] }
  0x31   :  { %489 = vmatpush1.bf16.msra.mxu0 %v197_v12  ;;  %v90_v12 = vld [vmem:[%s1720_s1 + $0x258] sm:$0xff] }
  0x32   :  { %490 = vmatprep.subr.bf16.mxu0 %v200_v13  ;;  %v392_v13 = vpack.c.bf16 %v292_v4, %v287_v3  ;;  %v212_v20 = vpack.c.bf16 %v90_v12, %v88_v11  ;;  %v348_v4 = vld [vmem:[%s1722_s2 + $0x2d8] sm:$0xff]  ;;  %v347_v12 = vld [vmem:[%s1722_s2 + $0x2d0] sm:$0xff] }
  0x34   :  { %630 = vmatpush1.bf16.msra.mxu1 %v392_v13  ;;  %v352_v13 = vld [vmem:[%s1722_s2 + $0x2f8] sm:$0xff] }
  0x35   :  { %491 = vmatpush1.bf16.msra.mxu0 %v199_v18  ;;  %v308_v18 = vld [vmem:[%s1722_s2 + $0x198] sm:$0xff]  ;;  %631 = vmatprep.subr.bf16.mxu1 %v398_v14  ;;  %v219_v14 = vpack.c.bf16 %v105_v41, %v103_v7 }
  0x36   :  { %492 = vmatprep.subr.bf16.mxu0 %v202_v19  ;;  %v313_v19 = vld [vmem:[%s1722_s2 + $0x1c0] sm:$0xff] }
  0x37   :  { %v403_v26 = vpack.c.bf16 %v313_v19, %v308_v18  ;;  %v112_v18 = vld [vmem:[%s1720_s1 + $0x308] sm:$0xff]  ;;  %v114_v19 = vld [vmem:[%s1720_s1 + $0x318] sm:$0xff] }
  0x38   :  { %v224_v22 = vpack.c.bf16 %v114_v19, %v112_v18  ;;  %v779_v19 = vmov 0  }
  0x39   :  { %493 = vmatpush1.bf16.msra.mxu0 %v201_v24  ;;  %v94_v24 = vld [vmem:[%s1720_s1 + $0x278] sm:$0xff] }
  0x3a   :  { %494 = vmatprep.subr.bf16.mxu0 %v204_v25  ;;  %v397_v25 = vpack.c.bf16 %v302_v16, %v297_v15  ;;  %v214_v32 = vpack.c.bf16 %v94_v24, %v92_v23  ;;  %v107_v16 = vld [vmem:[%s1720_s1 + $0x2e0] sm:$0xff]  ;;  %v113_v24 = vld [vmem:[%s1720_s1 + $0x310] sm:$0xff] }
  0x3b   :  { %v111_v23 = vld [vmem:[%s1720_s1 + $0x300] sm:$0xff] }
  0x3c   :  { %632 = vmatpush1.bf16.msra.mxu1 %v397_v25  ;;  %v116_v25 = vld [vmem:[%s1720_s1 + $0x328] sm:$0xff]  ;;  %v223_v27 = vpack.c.bf16 %v113_v24, %v111_v23  ;;  %v158_v24 = vld [vmem:[%s1720_s1 + $0x478] sm:$0xff] }
  0x3d   :  { %495 = vmatpush1.bf16.msra.mxu0 %v203_v38  ;;  %633 = vmatprep.subr.bf16.mxu1 %v403_v26  ;;  %v408_v38 = vpack.c.bf16 %v323_v31, %v318_v30  ;;  %v118_v26 = vld [vmem:[%s1720_s1 + $0x338] sm:$0xff]  ;;  %v117_v30 = vld [vmem:[%s1720_s1 + $0x330] sm:$0xff]  ;;  %v120_v31 = vld [vmem:[%s1720_s1 + $0x348] sm:$0xff] }
  0x3e   :  { %496 = vmatprep.subr.bf16.mxu0 %v206_v44  ;;  %v333_v44 = vld [vmem:[%s1722_s2 + $0x260] sm:$0xff]  ;;  %v226_v28 = vpack.c.bf16 %v118_v26, %v116_v25  ;;  %v156_v23 = vld [vmem:[%s1720_s1 + $0x468] sm:$0xff] }
  0x3f   :  { %v413_v52 = vpack.c.bf16 %v333_v44, %v328_v43  ;;  %v125_v43 = vld [vmem:[%s1720_s1 + $0x370] sm:$0xff]  ;;  %v128_v44 = vld [vmem:[%s1720_s1 + $0x388] sm:$0xff]  ;;  %v246_v26 = vpack.c.bf16 %v158_v24, %v156_v23  ;;  %v264_v23 = vld [vmem:[%s1722_s2 + $0x38] sm:$0xff] }
  0x40   :  { %634 = vmatpush1.bf16.msra.mxu1 %v402_v37  ;;  %v124_v37 = vld [vmem:[%s1720_s1 + $0x368] sm:$0xff] }
  0x41   :  { %497 = vmatpush1.bf16.msra.mxu0 %v205_v55  ;;  %635 = vmatprep.subr.bf16.mxu1 %v408_v38  ;;  %v215_v55 = vpack.c.bf16 %v97_v48, %v95_v47  ;;  %v126_v38 = vld [vmem:[%s1720_s1 + $0x378] sm:$0xff] }
  0x42   :  { %507 = vmatprep.subr.bf16.mxu0 %v208_v59  ;;  %v99_v59 = vld [vmem:[%s1720_s1 + $0x2a0] sm:$0xff]  ;;  %v230_v40 = vpack.c.bf16 %v126_v38, %v124_v37  ;;  %v250_v38 = vpack.c.bf16 %v166_v36, %v164_v35 }
  0x43   :  { %v217_v3 = vpack.c.bf16 %v101_v60, %v99_v59 }
  0x44   :  { %499 = vmatmul.mubr.bf16.vlgmr.msra.gmra.mrb[0].mxu0 %v450_v1  ;;  %636 = vmatpush1.bf16.msra.mxu1 %v407_v51  ;;  %v337_v1 = vld [vmem:[%s1722_s2 + $0x280] sm:$0xff]  ;;  %v132_v51 = vld [vmem:[%s1720_s1 + $0x3a8] sm:$0xff] }
  0x45   :  { %508 = vmatpush1.bf16.msra.mxu0 %v207_v5  ;;  %539 = vmatprep.mubr.bf16.mxu0 %v453_v6  ;;  %v353_v5 = vld [vmem:[%s1722_s2 + $0x300] sm:$0xff]  ;;  %v220_v6 = vpack.c.bf16 %v106_v62, %v104_v61  ;;  %v417_v10 = vpack.c.bf16 %v342_v2, %v337_v1  ;;  %v137_v62 = vld [vmem:[%s1720_s1 + $0x3d0] sm:$0xff] }
  0x46   :  { %509 = vmatprep.subr.bf16.mxu0 %v210_v8  ;;  %637 = vmatprep.subr.bf16.mxu1 %v413_v52  ;;  %v108_v8 = vld [vmem:[%s1720_s1 + $0x2e8] sm:$0xff]  ;;  %v423_v11 = vpack.c.bf16 %v353_v5, %v348_v4  ;;  %v134_v52 = vld [vmem:[%s1720_s1 + $0x3b8] sm:$0xff]  ;;  %v135_v61 = vld [vmem:[%s1720_s1 + $0x3c0] sm:$0xff] }
  0x47   :  { %v222_v15 = vpack.c.bf16 %v110_v9, %v108_v8  ;;  %v234_v54 = vpack.c.bf16 %v134_v52, %v132_v51  ;;  %v235_v1 = vpack.c.bf16 %v137_v62, %v135_v61  ;;  %v141_v4 = vld [vmem:[%s1720_s1 + $0x3f0] sm:$0xff]  ;;  %v144_v5 = vld [vmem:[%s1720_s1 + $0x408] sm:$0xff]  ;;  %v143_v8 = vld [vmem:[%s1720_s1 + $0x400] sm:$0xff]  ;;  %v254_v52 = vpack.c.bf16 %v174_v50, %v172_v49 }
  0x48   :  { %638 = vmatpush1.bf16.msra.mxu1 %v412_v63  ;;  %v140_v63 = vld [vmem:[%s1720_s1 + $0x3e8] sm:$0xff]  ;;  %v145_v9 = vld [vmem:[%s1720_s1 + $0x410] sm:$0xff]  ;;  %v357_v61 = vld [vmem:[%s1722_s2 + $0x320] sm:$0xff] }
  0x49   :  { %510 = vmatpush1.bf16.msra.mxu0 %v209_v17  ;;  %639 = vmatprep.subr.bf16.mxu1 %v418_v0  ;;  %v109_v17 = vld [vmem:[%s1720_s1 + $0x2f0] sm:$0xff]  ;;  %v142_v0 = vld [vmem:[%s1720_s1 + $0x3f8] sm:$0xff]  ;;  %v362_v62 = vld [vmem:[%s1722_s2 + $0x348] sm:$0xff] }
  0x4a   :  { %511 = vmatprep.subr.bf16.mxu0 %v212_v20  ;;  %v422_v20 = vpack.c.bf16 %v352_v13, %v347_v12  ;;  %v221_v21 = vpack.c.bf16 %v109_v17, %v107_v16  ;;  %v238_v2 = vpack.c.bf16 %v142_v0, %v140_v63  ;;  %v452_v12 = vpack.c.bf16 %v1026_v45, %v1026_v45  ;;  %v149_v16 = vld [vmem:[%s1720_s1 + $0x430] sm:$0xff]  ;;  %v152_v17 = vld [vmem:[%s1720_s1 + $0x448] sm:$0xff]  ;;  %v154_v45 = vld [vmem:[%s1720_s1 + $0x458] sm:$0xff] }
  0x4b   :  { %v239_v13 = vpack.c.bf16 %v145_v9, %v143_v8  ;;  %v427_v63 = vpack.c.bf16 %v362_v62, %v357_v61  ;;  %v368_v0 = vld [vmem:[%s1722_s2 + $0x378] sm:$0xff]  ;;  %v456_v8 = vlaneseq }
  0x4c   :  { %640 = vmatpush1.bf16.msra.mxu1 %v417_v10  ;;  %v148_v10 = vld [vmem:[%s1720_s1 + $0x428] sm:$0xff] }
  0x4d   :  { %512 = vmatpush1.bf16.msra.mxu0 %v211_v29  ;;  %641 = vmatprep.subr.bf16.mxu1 %v423_v11  ;;  %v115_v29 = vld [vmem:[%s1720_s1 + $0x320] sm:$0xff]  ;;  %v150_v11 = vld [vmem:[%s1720_s1 + $0x438] sm:$0xff]  ;;  %v1452_v9 = vshrl.u32 %v456_v8, 7 }
  0x4e   :  { %513 = vmatprep.subr.bf16.mxu0 %v214_v32  ;;  %v122_v32 = vld [vmem:[%s1720_s1 + $0x358] sm:$0xff]  ;;  %v225_v33 = vpack.c.bf16 %v117_v30, %v115_v29  ;;  %v160_v29 = vld [vmem:[%s1720_s1 + $0x488] sm:$0xff] }
  0x4f   :  { %v228_v34 = vpack.c.bf16 %v122_v32, %v120_v31  ;;  %v162_v30 = vld [vmem:[%s1720_s1 + $0x498] sm:$0xff] }
  0x50   :  { %642 = vmatpush1.bf16.msra.mxu1 %v422_v20  ;;  %v244_v20 = vpack.c.bf16 %v154_v45, %v152_v17  ;;  %v248_v32 = vpack.c.bf16 %v162_v30, %v160_v29 }
  0x51   :  { %514 = vmatpush1.bf16.msra.mxu0 %v213_v42  ;;  %v123_v42 = vld [vmem:[%s1720_s1 + $0x360] sm:$0xff] }
  0x52   :  { %515 = vmatprep.subr.bf16.mxu0 %v216_v46  ;;  %v130_v46 = vld [vmem:[%s1720_s1 + $0x398] sm:$0xff]  ;;  %v229_v47 = vpack.c.bf16 %v125_v43, %v123_v42  ;;  %v168_v42 = vld [vmem:[%s1720_s1 + $0x4c8] sm:$0xff] }
  0x53   :  { %v232_v48 = vpack.c.bf16 %v130_v46, %v128_v44  ;;  %v170_v43 = vld [vmem:[%s1720_s1 + $0x4d8] sm:$0xff] }
  0x54   :  { %v252_v46 = vpack.c.bf16 %v170_v43, %v168_v42 }
  0x55   :  { %516 = vmatpush1.bf16.msra.mxu0 %v215_v55  ;;  %v131_v55 = vld [vmem:[%s1720_s1 + $0x3a0] sm:$0xff] }
  0x56   :  { %517 = vmatprep.subr.bf16.mxu0 %v218_v58  ;;  %v138_v58 = vld [vmem:[%s1720_s1 + $0x3d8] sm:$0xff]  ;;  %v233_v59 = vpack.c.bf16 %v133_v56, %v131_v55  ;;  %v443_v55 = vld [vmem:[%s1721_s0 + $0x10] sm:$0xf] }
  0x57   :  { %v236_v60 = vpack.c.bf16 %v138_v58, %v136_v57  ;;  %v454_v57 = vpack.c.bf16 %v443_v55, %v443_v55  ;;  %v358_v58 = vld [vmem:[%s1722_s2 + $0x328] sm:$0xff] }
  0x59   :  { %518 = vmatpush1.bf16.msra.mxu0 %v217_v3  ;;  %v139_v3 = vld [vmem:[%s1720_s1 + $0x3e0] sm:$0xff] }
  0x5a   :  { %519 = vmatprep.subr.bf16.mxu0 %v220_v6  ;;  %v146_v6 = vld [vmem:[%s1720_s1 + $0x418] sm:$0xff]  ;;  %v237_v7 = vpack.c.bf16 %v141_v4, %v139_v3  ;;  %v367_v3 = vld [vmem:[%s1722_s2 + $0x370] sm:$0xff] }
  0x5b   :  { %v240_v41 = vpack.c.bf16 %v146_v6, %v144_v5  ;;  %v372_v4 = vld [vmem:[%s1722_s2 + $0x398] sm:$0xff] }
  0x5c   :  { %v432_v5 = vpack.c.bf16 %v372_v4, %v367_v3  ;;  %v260_v6 = vld [vmem:[%s1722_s2 + $0x18] sm:$0xff] }
  0x5d   :  { %520 = vmatpush1.bf16.msra.mxu0 %v219_v14  ;;  %v242_v14 = vpack.c.bf16 %v150_v11, %v148_v10  ;;  %v458_v10 = vsub.s32 0, %v1452_v9  ;;  %v760_v11 = vld [vmem:[%s1720_s1 + $0x500] ss:$8 sm:$0x3] }
  0x5e   :  { %521 = vmatprep.subr.bf16.mxu0 %v222_v15  ;;  %v147_v15 = vld [vmem:[%s1720_s1 + $0x420] sm:$0xff] }
  0x5f   :  { %v241_v18 = vpack.c.bf16 %v149_v16, %v147_v15 }
  0x61   :  { %522 = vmatpush1.bf16.msra.mxu0 %v221_v21  ;;  %v151_v21 = vld [vmem:[%s1720_s1 + $0x440] sm:$0xff] }
  0x62   :  { %523 = vmatprep.subr.bf16.mxu0 %v224_v22  ;;  %v153_v22 = vld [vmem:[%s1720_s1 + $0x450] sm:$0xff] }
  0x63   :  { %v243_v25 = vpack.c.bf16 %v153_v22, %v151_v21  ;;  %v259_v22 = vld [vmem:[%s1722_s2 + $0x10] sm:$0xff] }
  0x65   :  { %524 = vmatpush1.bf16.msra.mxu0 %v223_v27  ;;  %v155_v27 = vld [vmem:[%s1720_s1 + $0x460] sm:$0xff] }
  0x66   :  { %525 = vmatprep.subr.bf16.mxu0 %v226_v28  ;;  %v157_v28 = vld [vmem:[%s1720_s1 + $0x470] sm:$0xff] }
  0x67   :  { %v245_v31 = vpack.c.bf16 %v157_v28, %v155_v27  ;;  %v379_v28 = vpack.c.bf16 %v264_v23, %v259_v22  ;;  %v365_v22 = vld [vmem:[%s1722_s2 + $0x360] sm:$0xff] }
  0x69   :  { %526 = vmatpush1.bf16.msra.mxu0 %v225_v33  ;;  %v159_v33 = vld [vmem:[%s1720_s1 + $0x480] sm:$0xff] }
  0x6a   :  { %527 = vmatprep.subr.bf16.mxu0 %v228_v34  ;;  %v161_v34 = vld [vmem:[%s1720_s1 + $0x490] sm:$0xff] }
  0x6b   :  { %v247_v37 = vpack.c.bf16 %v161_v34, %v159_v33  ;;  %v280_v33 = vld [vmem:[%s1722_s2 + $0xb8] sm:$0xff]  ;;  %v285_v34 = vld [vmem:[%s1722_s2 + $0xe0] sm:$0xff] }
  0x6c   :  { %v390_v36 = vpack.c.bf16 %v285_v34, %v280_v33  ;;  %v369_v33 = vld [vmem:[%s1722_s2 + $0x380] sm:$0xff]  ;;  %v374_v34 = vld [vmem:[%s1722_s2 + $0x3a8] sm:$0xff] }
  0x6d   :  { %528 = vmatpush1.bf16.msra.mxu0 %v227_v39  ;;  %v163_v39 = vld [vmem:[%s1720_s1 + $0x4a0] sm:$0xff] }
  0x6e   :  { %529 = vmatprep.subr.bf16.mxu0 %v230_v40  ;;  %v165_v40 = vld [vmem:[%s1720_s1 + $0x4b0] sm:$0xff] }
  0x6f   :  { %v249_v44 = vpack.c.bf16 %v165_v40, %v163_v39  ;;  %v290_v39 = vld [vmem:[%s1722_s2 + $0x108] sm:$0xff]  ;;  %v295_v40 = vld [vmem:[%s1722_s2 + $0x130] sm:$0xff] }
  0x70   :  { %v395_v43 = vpack.c.bf16 %v295_v40, %v290_v39  ;;  %v271_v39 = vld [vmem:[%s1722_s2 + $0x70] sm:$0xff]  ;;  %v276_v40 = vld [vmem:[%s1722_s2 + $0x98] sm:$0xff] }
  0x71   :  { %530 = vmatpush1.bf16.msra.mxu0 %v229_v47  ;;  %v167_v47 = vld [vmem:[%s1720_s1 + $0x4c0] sm:$0xff] }
  0x72   :  { %531 = vmatprep.subr.bf16.mxu0 %v232_v48  ;;  %v169_v48 = vld [vmem:[%s1720_s1 + $0x4d0] sm:$0xff] }
  0x73   :  { %v251_v51 = vpack.c.bf16 %v169_v48, %v167_v47  ;;  %v300_v47 = vld [vmem:[%s1722_s2 + $0x158] sm:$0xff]  ;;  %v305_v48 = vld [vmem:[%s1722_s2 + $0x180] sm:$0xff] }
  0x74   :  { %v400_v50 = vpack.c.bf16 %v305_v48, %v300_v47  ;;  %v291_v47 = vld [vmem:[%s1722_s2 + $0x110] sm:$0xff] }
  0x75   :  { %532 = vmatpush1.bf16.msra.mxu0 %v231_v53  ;;  %v171_v53 = vld [vmem:[%s1720_s1 + $0x4e0] sm:$0xff] }
  0x76   :  { %533 = vmatprep.subr.bf16.mxu0 %v234_v54  ;;  %v173_v54 = vld [vmem:[%s1720_s1 + $0x4f0] sm:$0xff] }
  0x77   :  { %v253_v56 = vpack.c.bf16 %v173_v54, %v171_v53  ;;  %v310_v53 = vld [vmem:[%s1722_s2 + $0x1a8] sm:$0xff]  ;;  %v315_v54 = vld [vmem:[%s1722_s2 + $0x1d0] sm:$0xff] }
  0x79   :  { %534 = vmatpush1.bf16.msra.mxu0 %v233_v59  ;;  %v363_v59 = vld [vmem:[%s1722_s2 + $0x350] sm:$0xff] }
  0x7a   :  { %535 = vmatprep.subr.bf16.mxu0 %v236_v60  ;;  %v428_v60 = vpack.c.bf16 %v363_v59, %v358_v58  ;;  %v314_v58 = vld [vmem:[%s1722_s2 + $0x1c8] sm:$0xff]  ;;  %v320_v59 = vld [vmem:[%s1722_s2 + $0x1f8] sm:$0xff] }
  0x7c   :  { %643 = vmatprep.subr.bf16.mxu1 %v428_v60  ;;  %v325_v60 = vld [vmem:[%s1722_s2 + $0x220] sm:$0xff] }
  0x7d   :  { %536 = vmatpush1.bf16.msra.mxu0 %v235_v1  ;;  %644 = vmatpush1.bf16.msra.mxu1 %v427_v63  ;;  %v373_v1 = vld [vmem:[%s1722_s2 + $0x3a0] sm:$0xff]  ;;  %v410_v62 = vpack.c.bf16 %v325_v60, %v320_v59  ;;  %v319_v63 = vld [vmem:[%s1722_s2 + $0x1f0] sm:$0xff]  ;;  %v336_v59 = vld [vmem:[%s1722_s2 + $0x278] sm:$0xff] }
  0x7e   :  { %537 = vmatprep.subr.bf16.mxu0 %v238_v2  ;;  %v433_v2 = vpack.c.bf16 %v373_v1, %v368_v0  ;;  %v324_v0 = vld [vmem:[%s1722_s2 + $0x218] sm:$0xff]  ;;  %v330_v1 = vld [vmem:[%s1722_s2 + $0x248] sm:$0xff] }
  0x7f   :  { %v409_v3 = vpack.c.bf16 %v324_v0, %v319_v63  ;;  %v351_v0 = vld [vmem:[%s1722_s2 + $0x2f0] sm:$0xff] }
  0x80   :  { %645 = vmatprep.subr.bf16.mxu1 %v433_v2  ;;  %v335_v2 = vld [vmem:[%s1722_s2 + $0x270] sm:$0xff] }
  0x81   :  { %538 = vmatpush1.bf16.msra.mxu0 %v237_v7  ;;  %646 = vmatpush1.bf16.msra.mxu1 %v432_v5  ;;  %v265_v7 = vld [vmem:[%s1722_s2 + $0x40] sm:$0xff]  ;;  %v415_v4 = vpack.c.bf16 %v335_v2, %v330_v1  ;;  %v356_v1 = vld [vmem:[%s1722_s2 + $0x318] sm:$0xff] }
  0x82   :  { %548 = vmatprep.subr.bf16.mxu0 %v240_v41  ;;  %v380_v41 = vpack.c.bf16 %v265_v7, %v260_v6  ;;  %v329_v5 = vld [vmem:[%s1722_s2 + $0x240] sm:$0xff]  ;;  %v334_v6 = vld [vmem:[%s1722_s2 + $0x268] sm:$0xff]  ;;  %v340_v7 = vld [vmem:[%s1722_s2 + $0x298] sm:$0xff]  ;;  %v426_v2 = vpack.c.bf16 %v356_v1, %v351_v0 }
  0x83   :  { %v414_v8 = vpack.c.bf16 %v334_v6, %v329_v5  ;;  %v371_v6 = vld [vmem:[%s1722_s2 + $0x390] sm:$0xff] }
  0x84   :  { %540 = vmatmul.mubr.bf16.vlgmr.msra.gmra.mrb[0].mxu0 %v452_v12  ;;  %664 = vmatprep.subr.bf16.mxu1 %v380_v41  ;;  %v462_v12 = vsub.s32 1, %v1452_v9  ;;  %v345_v41 = vld [vmem:[%s1722_s2 + $0x2c0] sm:$0xff] }
  0x85   :  { %549 = vmatpush1.bf16.msra.mxu0 %v239_v13  ;;  %580 = vmatprep.mubr.bf16.mxu0 %v779_v19  ;;  %v459_v13 = vrot.slane %v760_v11, %v458_v10 }
  0x86   :  { %550 = vmatprep.subr.bf16.mxu0 %v242_v14  ;;  %v463_v14 = vrot.slane %v760_v11, %v462_v12  ;;  %v420_v11 = vpack.c.bf16 %v345_v41, %v340_v7  ;;  %v376_v7 = vld [vmem:[%s1722_s2 + $0x3b8] sm:$0xff] }
  0x87   :  { %v436_v41 = vpack.c.bf16 %v376_v7, %v371_v6 }
  0x89   :  { %551 = vmatpush1.bf16.msra.mxu0 %v241_v18 }
  0x8a   :  { %552 = vmatprep.subr.bf16.mxu0 %v244_v20 }
  0x8d   :  { %553 = vmatpush1.bf16.msra.mxu0 %v243_v25  ;;  %v270_v25 = vld [vmem:[%s1722_s2 + $0x68] sm:$0xff] }
  0x8e   :  { %554 = vmatprep.subr.bf16.mxu0 %v246_v26  ;;  %v275_v26 = vld [vmem:[%s1722_s2 + $0x90] sm:$0xff] }
  0x8f   :  { %v385_v30 = vpack.c.bf16 %v275_v26, %v270_v25  ;;  %v359_v25 = vld [vmem:[%s1722_s2 + $0x330] sm:$0xff]  ;;  %v364_v26 = vld [vmem:[%s1722_s2 + $0x358] sm:$0xff] }
  0x91   :  { %555 = vmatpush1.bf16.msra.mxu0 %v245_v31  ;;  %v269_v31 = vld [vmem:[%s1722_s2 + $0x60] sm:$0xff] }
  0x92   :  { %556 = vmatprep.subr.bf16.mxu0 %v248_v32  ;;  %v274_v32 = vld [vmem:[%s1722_s2 + $0x88] sm:$0xff] }
  0x93   :  { %v384_v35 = vpack.c.bf16 %v274_v32, %v269_v31  ;;  %v429_v31 = vpack.c.bf16 %v364_v26, %v359_v25 }
  0x95   :  { %557 = vmatpush1.bf16.msra.mxu0 %v247_v37  ;;  %v279_v37 = vld [vmem:[%s1722_s2 + $0xb0] sm:$0xff] }
  0x96   :  { %558 = vmatprep.subr.bf16.mxu0 %v250_v38  ;;  %v284_v38 = vld [vmem:[%s1722_s2 + $0xd8] sm:$0xff] }
  0x97   :  { %v389_v42 = vpack.c.bf16 %v284_v38, %v279_v37  ;;  %v266_v37 = vld [vmem:[%s1722_s2 + $0x48] sm:$0xff] }
  0x99   :  { %559 = vmatpush1.bf16.msra.mxu0 %v249_v44  ;;  %v289_v44 = vld [vmem:[%s1722_s2 + $0x100] sm:$0xff] }
  0x9a   :  { %560 = vmatprep.subr.bf16.mxu0 %v252_v46  ;;  %v294_v46 = vld [vmem:[%s1722_s2 + $0x128] sm:$0xff] }
  0x9b   :  { %v394_v49 = vpack.c.bf16 %v294_v46, %v289_v44  ;;  %v286_v44 = vld [vmem:[%s1722_s2 + $0xe8] sm:$0xff] }
  0x9d   :  { %561 = vmatpush1.bf16.msra.mxu0 %v251_v51  ;;  %v299_v51 = vld [vmem:[%s1722_s2 + $0x150] sm:$0xff] }
  0x9e   :  { %562 = vmatprep.subr.bf16.mxu0 %v254_v52  ;;  %v304_v52 = vld [vmem:[%s1722_s2 + $0x178] sm:$0xff] }
  0x9f   :  { %v399_v55 = vpack.c.bf16 %v304_v52, %v299_v51  ;;  %v311_v52 = vld [vmem:[%s1722_s2 + $0x1b0] sm:$0xff] }
  0xa1   :  { %563 = vmatpush1.bf16.msra.mxu0 %v253_v56  ;;  %v405_v56 = vpack.c.bf16 %v315_v54, %v310_v53  ;;  %v316_v53 = vld [vmem:[%s1722_s2 + $0x1d8] sm:$0xff] }
  0xa2   :  { %v406_v54 = vpack.c.bf16 %v316_v53, %v311_v52 }
  0xa4   :  { %581 = vmatmul.mubr.bf16.vlgmr.msra.gmra.mrb[0].mxu0 %v454_v57  ;;  %v309_v57 = vld [vmem:[%s1722_s2 + $0x1a0] sm:$0xff] }
  0xa5   :  { %v404_v61 = vpack.c.bf16 %v314_v58, %v309_v57  ;;  %v331_v58 = vld [vmem:[%s1722_s2 + $0x250] sm:$0xff] }
  0xa6   :  { %v416_v60 = vpack.c.bf16 %v336_v59, %v331_v58 }
 0x177   :  { %v582_v15 = vpop.f32.mrb[0].mxu0 }
 0x178   :  { %v766_v16 = vadd.f32 %v582_v15, %v459_v13  ;;  %v584_v17 = vpop.f32.mrb[1].mxu0  ;;  %v339_v13 = vld [vmem:[%s1722_s2 + $0x290] sm:$0xff]  ;;  %v350_v15 = vld [vmem:[%s1722_s2 + $0x2e8] sm:$0xff] }
 0x179   :  { %v767_v45 = vadd.f32 %v584_v17, %v463_v14  ;;  %v586_v18 = vpop.f32.mrb[2].mxu0  ;;  %v344_v14 = vld [vmem:[%s1722_s2 + $0x2b8] sm:$0xff] }
 0x17a   :  { %v589_v20 = vmax.f32 %v766_v16, 0.0  ;;  %v587_v21 = vpop.f32.mrb[3].mxu0  ;;  %v355_v16 = vld [vmem:[%s1722_s2 + $0x310] sm:$0xff]  ;;  %v419_v17 = vpack.c.bf16 %v344_v14, %v339_v13  ;;  %v349_v18 = vld [vmem:[%s1722_s2 + $0x2e0] sm:$0xff] }
 0x17b   :  { %v590_v24 = vmax.f32 %v767_v45, 0.0  ;;  %v425_v45 = vpack.c.bf16 %v355_v16, %v350_v15  ;;  %v360_v21 = vld [vmem:[%s1722_s2 + $0x338] sm:$0xff] }
 0x17c   :  { %v1477_v29 = vpack.c.bf16 %v589_v20, %v589_v20  ;;  %v354_v20 = vld [vmem:[%s1722_s2 + $0x308] sm:$0xff] }
 0x17d   :  { %v1475_v27 = vpack.c.bf16 %v590_v24, %v590_v24  ;;  %v424_v23 = vpack.c.bf16 %v354_v20, %v349_v18  ;;  %v430_v24 = vpack.c.bf16 %v365_v22, %v360_v21  ;;  %v604_v21 = vsub.s32 2, %v1452_v9 }
 0x17e   :  { %v608_v22 = vsub.s32 3, %v1452_v9 }
 0x17f   :  { %763 = vmatprep.mubr.msk.bf16.mxu1 %vm619_vm0, %v1475_v27 }
 0x180   :  { %656 = vmatmul.mubr.bf16.vlgmr.msra.gmra.mrb[0].mxu1 %v1477_v29 }
 0x181   :  { %665 = vmatpush1.bf16.msra.mxu1 %v379_v28  ;;  %764 = vmatprep.mubr.msk.bf16.mxu1 %vm619_vm0, %v1475_v27  ;;  %v370_v28 = vld [vmem:[%s1722_s2 + $0x388] sm:$0xff] }
 0x182   :  { %666 = vmatprep.subr.bf16.mxu1 %v385_v30  ;;  %v375_v30 = vld [vmem:[%s1722_s2 + $0x3b0] sm:$0xff] }
 0x183   :  { %v435_v32 = vpack.c.bf16 %v375_v30, %v370_v28 }
 0x185   :  { %667 = vmatpush1.bf16.msra.mxu1 %v384_v35  ;;  %v434_v35 = vpack.c.bf16 %v374_v34, %v369_v33 }
 0x186   :  { %668 = vmatprep.subr.bf16.mxu1 %v390_v36  ;;  %v261_v36 = vld [vmem:[%s1722_s2 + $0x20] sm:$0xff] }
 0x187   :  { %v381_v38 = vpack.c.bf16 %v266_v37, %v261_v36 }
 0x189   :  { %669 = vmatpush1.bf16.msra.mxu1 %v389_v42  ;;  %v386_v42 = vpack.c.bf16 %v276_v40, %v271_v39 }
 0x18a   :  { %670 = vmatprep.subr.bf16.mxu1 %v395_v43  ;;  %v281_v43 = vld [vmem:[%s1722_s2 + $0xc0] sm:$0xff] }
 0x18b   :  { %v391_v46 = vpack.c.bf16 %v286_v44, %v281_v43 }
 0x18d   :  { %671 = vmatpush1.bf16.msra.mxu1 %v394_v49  ;;  %v301_v49 = vld [vmem:[%s1722_s2 + $0x160] sm:$0xff] }
 0x18e   :  { %672 = vmatprep.subr.bf16.mxu1 %v400_v50  ;;  %v306_v50 = vld [vmem:[%s1722_s2 + $0x188] sm:$0xff] }
 0x18f   :  { %v401_v51 = vpack.c.bf16 %v306_v50, %v301_v49 }
 0x191   :  { %673 = vmatpush1.bf16.msra.mxu1 %v399_v55  ;;  %v321_v55 = vld [vmem:[%s1722_s2 + $0x200] sm:$0xff] }
 0x192   :  { %674 = vmatprep.subr.bf16.mxu1 %v405_v56  ;;  %v326_v56 = vld [vmem:[%s1722_s2 + $0x228] sm:$0xff] }
 0x193   :  { %v411_v57 = vpack.c.bf16 %v326_v56, %v321_v55 }
 0x195   :  { %675 = vmatpush1.bf16.msra.mxu1 %v404_v61  ;;  %v341_v61 = vld [vmem:[%s1722_s2 + $0x2a0] sm:$0xff] }
 0x196   :  { %676 = vmatprep.subr.bf16.mxu1 %v410_v62  ;;  %v346_v62 = vld [vmem:[%s1722_s2 + $0x2c8] sm:$0xff] }
 0x197   :  { %v421_v63 = vpack.c.bf16 %v346_v62, %v341_v61 }
 0x199   :  { %677 = vmatpush1.bf16.msra.mxu1 %v409_v3  ;;  %v361_v3 = vld [vmem:[%s1722_s2 + $0x340] sm:$0xff] }
 0x19a   :  { %678 = vmatprep.subr.bf16.mxu1 %v415_v4  ;;  %v366_v4 = vld [vmem:[%s1722_s2 + $0x368] sm:$0xff] }
 0x19b   :  { %v431_v5 = vpack.c.bf16 %v366_v4, %v361_v3 }
 0x19d   :  { %679 = vmatpush1.bf16.msra.mxu1 %v414_v8  ;;  %v761_v8 = vld [vmem:[%s1722_s2 + $0x3c0] ss:$8 sm:$0xf] }
 0x19e   :  { %680 = vmatprep.subr.bf16.mxu1 %v420_v11  ;;  %v762_v11 = vld [vmem:[%s1722_s2 + $0x3c0] ss:$8 sm:$0x10] }
 0x19f   :  { %v440_v13 = vor.u32 %v762_v11, %v761_v8 }
 0x1a1   :  { %681 = vmatpush1.bf16.msra.mxu1 %v419_v17  ;;  %v597_v14 = vrot.slane %v440_v13, %v458_v10  ;;  %v601_v15 = vrot.slane %v440_v13, %v462_v12  ;;  %v609_v10 = vrot.slane %v440_v13, %v608_v22 }
 0x1a2   :  { %682 = vmatprep.subr.bf16.mxu1 %v425_v45 }
 0x1a5   :  { %683 = vmatpush1.bf16.msra.mxu1 %v424_v23  ;;  %v605_v23 = vrot.slane %v440_v13, %v604_v21 }
 0x1a6   :  { %684 = vmatprep.subr.bf16.mxu1 %v430_v24 }
 0x1a9   :  { %685 = vmatpush1.bf16.msra.mxu1 %v429_v31 }
 0x1aa   :  { %686 = vmatprep.subr.bf16.mxu1 %v435_v32  ;;  %v612_v32 = vsub.s32 4, %v1452_v9 }
 0x1ac   :  { %v613_v33 = vrot.slane %v440_v13, %v612_v32 }
 0x1ad   :  { %687 = vmatpush1.bf16.msra.mxu1 %v434_v35 }
 0x1ae   :  { %705 = vmatprep.subr.bf16.mxu1 %v779_v19 }
 0x1b0   :  { %697 = vmatmul.mubr.bf16.vlgmr.msra.gmra.mrb[4].mxu1 %v1477_v29 }
 0x1b1   :  { %706 = vmatpush1.bf16.msra.mxu1 %v381_v38  ;;  %765 = vmatprep.mubr.msk.bf16.mxu1 %vm619_vm0, %v1475_v27  ;;  %v296_v27 = vld [vmem:[%s1722_s2 + $0x138] sm:$0xff] }
 0x1b2   :  { %707 = vmatprep.subr.bf16.mxu1 %v779_v19  ;;  %v396_v48 = vpack.c.bf16 %v296_v27, %v291_v47 }
 0x1b5   :  { %708 = vmatpush1.bf16.msra.mxu1 %v386_v42 }
 0x1b6   :  { %709 = vmatprep.subr.bf16.mxu1 %v779_v19 }
 0x1b9   :  { %710 = vmatpush1.bf16.msra.mxu1 %v391_v46 }
 0x1ba   :  { %711 = vmatprep.subr.bf16.mxu1 %v779_v19 }
 0x1bd   :  { %712 = vmatpush1.bf16.msra.mxu1 %v396_v48 }
 0x1be   :  { %713 = vmatprep.subr.bf16.mxu1 %v779_v19 }
 0x1c1   :  { %714 = vmatpush1.bf16.msra.mxu1 %v401_v51 }
 0x1c2   :  { %715 = vmatprep.subr.bf16.mxu1 %v779_v19 }
 0x1c5   :  { %716 = vmatpush1.bf16.msra.mxu1 %v406_v54 }
 0x1c6   :  { %717 = vmatprep.subr.bf16.mxu1 %v779_v19 }
 0x1c9   :  { %718 = vmatpush1.bf16.msra.mxu1 %v411_v57 }
 0x1ca   :  { %719 = vmatprep.subr.bf16.mxu1 %v779_v19 }
 0x1cd   :  { %720 = vmatpush1.bf16.msra.mxu1 %v416_v60 }
 0x1ce   :  { %721 = vmatprep.subr.bf16.mxu1 %v779_v19 }
 0x1d1   :  { %722 = vmatpush1.bf16.msra.mxu1 %v421_v63 }
 0x1d2   :  { %723 = vmatprep.subr.bf16.mxu1 %v779_v19 }
 0x1d5   :  { %724 = vmatpush1.bf16.msra.mxu1 %v426_v2 }
 0x1d6   :  { %725 = vmatprep.subr.bf16.mxu1 %v779_v19 }
 0x1d9   :  { %726 = vmatpush1.bf16.msra.mxu1 %v431_v5 }
 0x1da   :  { %727 = vmatprep.subr.bf16.mxu1 %v779_v19 }
 0x1dd   :  { %728 = vmatpush1.bf16.msra.mxu1 %v436_v41 }
 0x1e0   :  { %738 = vmatmul.mubr.bf16.vlgmr.msra.gmra.mrb[8].mxu1 %v1477_v29 }
 0x253   :  { %v657_v16 = vpop.f32.mrb[0].mxu1 }
 0x254   :  { %v658_v19 = vadd.f32 %v657_v16, %v597_v14  ;;  %v659_v17 = vpop.f32.mrb[1].mxu1 }
 0x255   :  { %v660_v45 = vadd.f32 %v659_v17, %v601_v15  ;;  %v661_v29 = vpop.f32.mrb[2].mxu1 }
 0x256   :  { %v662_v18 = vpop.f32.mrb[3].mxu1 }
 0x257   :  { %v749_v20 = vcombine.low %v658_v19, %v660_v45 }
 0x259   :  { %753 = vst [vmem:[%s1723_s3] sm:$0xff] %v749_v20 }
 0x283   :  { %v698_v24 = vpop.f32.mrb[4].mxu1 }
 0x284   :  { %v699_v25 = vadd.f32 %v698_v24, %v605_v23  ;;  %v700_v12 = vpop.f32.mrb[5].mxu1 }
 0x285   :  { %v701_v26 = vadd.f32 %v700_v12, %v609_v10  ;;  %v702_v28 = vpop.f32.mrb[6].mxu1 }
 0x286   :  { %v703_v30 = vpop.f32.mrb[7].mxu1 }
 0x287   :  { %v750_v31 = vcombine.low %v699_v25, %v701_v26 }
 0x289   :  { %754 = vst [vmem:[%s1723_s3 + $0x8] sm:$0xff] %v750_v31 }
 0x2b3   :  { %v739_v34 = vpop.f32.mrb[8].mxu1 }
 0x2b4   :  { %v740_v35 = vadd.f32 %v739_v34, %v613_v33  ;;  %v741_v36 = vpop.f32.mrb[9].mxu1 }
 0x2b5   :  { %v742_v37 = vpop.f32.mrb[10].mxu1 }
 0x2b6   :  { %755 = vst [vmem:[%s1723_s3 + $0x10] sm:$0xf] %v740_v35  ;;  %v743_v38 = vpop.f32.mrb[11].mxu1 }

</bundles_post_ra>
